<compile_context>
chip_gen: v7x
topology: tpu7x:2x2x1
jax: 0.10.0
libtpu: 0.0.40
codegen_flags: <defaults>
</compile_context>

<pallas_src>
import math

import jax
import jax.numpy as jnp
from jax.experimental import pallas as pl
from jax.experimental.pallas import tpu as pltpu


_SUBLANE = 8
_LANE = 128
_TILE_BYTES = 4 * 1024 * 1024      # per x-block budget
_VMEM_LIMIT = 32 * 1024 * 1024     # safe on v5e/v6e (128 MiB) and v7x (64 MiB)


# ---------------------------------------------------------------------------
# Pallas kernels
# ---------------------------------------------------------------------------
def _stats_kernel(x_ref, sum_ref, sumsq_ref):
    """Per-row (= per (n, c)) sum and sum-of-squares over the lane (spatial)
    axis.  The lane axis may be tiled; the (tm, 1) outputs stay resident
    across it and accumulate (reduction axis is last -> 'arbitrary')."""
    @pl.when(pl.program_id(1) == 0)
    def _():
        sum_ref[...] = jnp.zeros_like(sum_ref)
        sumsq_ref[...] = jnp.zeros_like(sumsq_ref)

    x = x_ref[...].astype(jnp.float32)
    sum_ref[...] += jnp.sum(x, axis=1, keepdims=True)
    sumsq_ref[...] += jnp.sum(x * x, axis=1, keepdims=True)


def _renorm_kernel(x_ref, scale_ref, shift_ref, o_ref):
    """out = x * scale + shift (scale/shift are per-row, broadcast on lanes)."""
    x = x_ref[...].astype(jnp.float32)
    o_ref[...] = (x * scale_ref[...] + shift_ref[...]).astype(o_ref.dtype)


# ---------------------------------------------------------------------------
# VMEM-budget-aware tile selection
# ---------------------------------------------------------------------------
def _pick_lane_tile(lanes, itemsize):
    """Largest lane tile that divides `lanes`, is a multiple of 128, and keeps
    an 8-row block under the budget; full `lanes` if it already fits or if the
    lane extent is not 128-aligned (full-extent blocks are always legal)."""
    if lanes % _LANE != 0 or lanes * _SUBLANE * itemsize <= _TILE_BYTES:
        return lanes
    nblk = lanes // _LANE
    best = _LANE
    for k in range(1, nblk + 1):
        if nblk % k == 0 and (k * _LANE) * _SUBLANE * itemsize <= _TILE_BYTES:
            best = k * _LANE
    return best


def _pick_row_tile(rows, lane_tile, itemsize):
    """Row tile: a multiple of 8, filling the per-block budget, never larger
    than the row count (ragged row counts get a partial last block via cdiv)."""
    if rows <= _SUBLANE:
        return rows                                  # full extent: always legal
    tm = _TILE_BYTES // max(1, lane_tile * itemsize)
    tm = max(_SUBLANE, (tm // _SUBLANE) * _SUBLANE)
    tm = min(tm, (rows // _SUBLANE) * _SUBLANE)      # never exceed array extent
    return tm


# ---------------------------------------------------------------------------
# Wrappers around pallas_call
# ---------------------------------------------------------------------------
def _batch_stats(x2d):
    """Per-row sum / sum-of-squares over the lane axis of an [R, L] array."""
    rows, lanes = x2d.shape
    itemsize = jnp.dtype(x2d.dtype).itemsize
    tl = _pick_lane_tile(lanes, itemsize)
    tm = _pick_row_tile(rows, tl, itemsize)
    grid = (pl.cdiv(rows, tm), lanes // tl)
    out_spec = pl.BlockSpec((tm, 1), lambda i, j: (i, 0))
    s, ss = pl.pallas_call(
        _stats_kernel,
        out_shape=(jax.ShapeDtypeStruct((rows, 1), jnp.float32),
                   jax.ShapeDtypeStruct((rows, 1), jnp.float32)),
        grid_spec=pltpu.PrefetchScalarGridSpec(
            num_scalar_prefetch=0,
            grid=grid,
            in_specs=[pl.BlockSpec((tm, tl), lambda i, j: (i, j))],
            out_specs=(out_spec, out_spec)),
        compiler_params=pltpu.CompilerParams(
            dimension_semantics=("parallel", "arbitrary"),
            vmem_limit_bytes=_VMEM_LIMIT),
    )(x2d)
    return s, ss


def _apply_renorm(x2d, scale_rows, shift_rows):
    """Elementwise x * scale + shift on an [R, L] array (per-row scale/shift)."""
    rows, lanes = x2d.shape
    itemsize = jnp.dtype(x2d.dtype).itemsize
    tl = _pick_lane_tile(lanes, itemsize)
    tm = _pick_row_tile(rows, tl, itemsize)
    grid = (pl.cdiv(rows, tm), lanes // tl)
    vspec = pl.BlockSpec((tm, 1), lambda i, j: (i, 0))
    return pl.pallas_call(
        _renorm_kernel,
        out_shape=jax.ShapeDtypeStruct((rows, lanes), x2d.dtype),
        grid_spec=pltpu.PrefetchScalarGridSpec(
            num_scalar_prefetch=0,
            grid=grid,
            in_specs=[pl.BlockSpec((tm, tl), lambda i, j: (i, j)), vspec, vspec],
            out_specs=pl.BlockSpec((tm, tl), lambda i, j: (i, j))),
        compiler_params=pltpu.CompilerParams(
            dimension_semantics=("parallel", "parallel"),
            vmem_limit_bytes=_VMEM_LIMIT),
    )(x2d, scale_rows, shift_rows)


# ---------------------------------------------------------------------------
# BatchRenorm forward (mirrors the PyTorch module)
# ---------------------------------------------------------------------------
def batch_renorm(x, running_mean, running_std, num_batches_tracked,
                 weight, bias, *, training=True, eps=1e-3, momentum=0.01,
                 affine=True):
    """Returns (output, (new_running_mean, new_running_std, new_num_batches_tracked))."""
    orig_shape = x.shape
    n, c = x.shape[0], x.shape[1]
    # For ndim == 2 the spatial extent is 1 (degenerate lane dim but correct).
    l = int(math.prod(x.shape[2:])) if x.ndim > 2 else 1
    x2d = x.reshape(n * c, l)            # free view of contiguous NCHW

    running_mean = jnp.asarray(running_mean, jnp.float32)
    running_std = jnp.asarray(running_std, jnp.float32)
    sg = jax.lax.stop_gradient

    count = n * l
    if training:
        row_sum, row_sumsq = _batch_stats(x2d)             # (n*c, 1) f32
        ch_sum = row_sum.reshape(n, c).sum(axis=0)         # tiny combine in JAX
        ch_sumsq = row_sumsq.reshape(n, c).sum(axis=0)
        batch_mean = ch_sum / count
        # E[x^2] - E[x]^2 in f32; matches std(unbiased=False) closely for
        # activation-scale data (clamped at 0 for safety).
        var = jnp.maximum(ch_sumsq / count - batch_mean * batch_mean, 0.0)
        batch_std = jnp.sqrt(var) + eps                    # std + eps (as in ref)

        nbt = num_batches_tracked.astype(jnp.float32)
        rmax = jnp.clip(2.0 / 35000.0 * nbt + 25.0 / 35.0, 1.0, 3.0)
        dmax = jnp.clip(5.0 / 20000.0 * nbt - 25.0 / 20.0, 0.0, 5.0)

        r = jnp.clip(sg(batch_std) / running_std, 1.0 / rmax, rmax)
        d = jnp.clip((sg(batch_mean) - running_mean) / running_std, -dmax, dmax)

        mean_used, std_used = batch_mean, batch_std
        new_running_mean = running_mean + momentum * (sg(batch_mean) - running_mean)
        new_running_std = running_std + momentum * (sg(batch_std) - running_std)
        new_nbt = num_batches_tracked + 1
    else:
        mean_used, std_used = running_mean, running_std
        r = jnp.ones((c,), jnp.float32)
        d = jnp.zeros((c,), jnp.float32)
        new_running_mean, new_running_std, new_nbt = (
            running_mean, running_std, num_batches_tracked)

    if affine:
        w = jnp.asarray(weight, jnp.float32)
        b = jnp.asarray(bias, jnp.float32)
    else:
        w = jnp.ones((c,), jnp.float32)
        b = jnp.zeros((c,), jnp.float32)

    # Fold everything into per-channel scale/shift:
    #   out = w * ((x - mean)/std * r + d) + b  ==  x * scale + shift
    inv = r / std_used
    scale = w * inv
    shift = w * (d - mean_used * inv) + b

    # Expand to per-row (n*c, 1) vectors (row = n*C + c  ->  channel = row % C).
    scale_rows = jnp.tile(scale, n).reshape(n * c, 1)
    shift_rows = jnp.tile(shift, n).reshape(n * c, 1)

    out2d = _apply_renorm(x2d, scale_rows, shift_rows)
    out = out2d.reshape(orig_shape)
    return out, (new_running_mean, new_running_std, new_nbt)


# ---------------------------------------------------------------------------
# Pure-JAX reference (mirrors the PyTorch forward) for a sanity check
# ---------------------------------------------------------------------------
def _reference(x, rm, rs, nbt, w, b, *, training, eps=1e-3):
    xt = jnp.swapaxes(x, 1, -1) if x.ndim > 2 else x
    if training:
        dims = tuple(range(xt.ndim - 1))
        bm = xt.mean(dims)
        bs = xt.std(dims) + eps
        nbt_f = nbt.astype(jnp.float32)
        rmax = jnp.clip(2.0 / 35000.0 * nbt_f + 25.0 / 35.0, 1.0, 3.0)
        dmax = jnp.clip(5.0 / 20000.0 * nbt_f - 25.0 / 20.0, 0.0, 5.0)
        r = jnp.clip(bs / rs, 1.0 / rmax, rmax)
        d = jnp.clip((bm - rm) / rs, -dmax, dmax)
        y = (xt - bm) / bs * r + d
    else:
        y = (xt - rm) / rs
    y = w * y + b
    return jnp.swapaxes(y, 1, -1) if x.ndim > 2 else y


# ---------------------------------------------------------------------------
if __name__ == "__main__":
    key = jax.random.PRNGKey(0)

    # ---- Test 1: NCHW with lane-dense spatial extent (H*W = 256) -----------
    n, c, h, w = 2, 4, 16, 16
    x = jax.random.normal(key, (n, c, h, w), dtype=jnp.float32)

    running_mean = jnp.zeros((c,), jnp.float32)
    running_std = jnp.ones((c,), jnp.float32)
    num_batches_tracked = jnp.array(0, jnp.int32)
    weight = jnp.ones((c,), jnp.float32)
    bias = jnp.zeros((c,), jnp.float32)

    out_train, (rm, rs, nbt) = batch_renorm(
        x, running_mean, running_std, num_batches_tracked, weight, bias,
        training=True)
    out_eval, _ = batch_renorm(x, rm, rs, nbt, weight, bias, training=False)

    jax.block_until_ready((out_train, out_eval, rm, rs))
    assert out_train.shape == (n, c, h, w) and out_eval.shape == (n, c, h, w)

    ref_train = _reference(x, running_mean, running_std, num_batches_tracked,
                           weight, bias, training=True)
    ref_eval = _reference(x, rm, rs, nbt, weight, bias, training=False)
    assert jnp.allclose(out_train, ref_train, atol=1e-4, rtol=1e-4)
    assert jnp.allclose(out_eval, ref_eval, atol=1e-4, rtol=1e-4)

    # ---- Test 2: ragged shapes (rows not multiple of 8, lanes not of 128) --
    n2, c2, h2, w2 = 3, 5, 7, 7
    x2 = jax.random.normal(jax.random.PRNGKey(1), (n2, c2, h2, w2),
                           dtype=jnp.float32)
    rm2 = jnp.zeros((c2,), jnp.float32)
    rs2 = jnp.ones((c2,), jnp.float32)
    nbt2 = jnp.array(3, jnp.int32)
    w2p = jnp.full((c2,), 0.5, jnp.float32)
    b2p = jnp.full((c2,), -0.25, jnp.float32)

    out2, _ = batch_renorm(x2, rm2, rs2, nbt2, w2p, b2p, training=True)
    jax.block_until_ready(out2)
    ref2 = _reference(x2, rm2, rs2, nbt2, w2p, b2p, training=True)
    assert out2.shape == (n2, c2, h2, w2)
    assert jnp.allclose(out2, ref2, atol=1e-4, rtol=1e-4)

    print("KERNEL_OK")
</pallas_src>

<mosaic_0001>
module attributes {stable_mosaic.version = 11 : i64} {
  func.func @_stats_kernel(%arg0: i32, %arg1: i32, %arg2: memref<8x256xf32, #tpu.memory_space<vmem>>, %arg3: memref<8x1xf32, #tpu.memory_space<vmem>>, %arg4: memref<8x1xf32, #tpu.memory_space<vmem>>) attributes {dimension_semantics = [#tpu.dimension_semantics<parallel>, #tpu.dimension_semantics<arbitrary>], iteration_bounds = array<i64: 1, 1>, scalar_prefetch = 0 : i64, scratch_operands = 0 : i64, tpu.core_type = #tpu.core_type<tc>, window_params = [{transform_indices = @transform_0, window_bounds = array<i64: 8, 256>}, {transform_indices = @transform_1, window_bounds = array<i64: 8, 1>}, {transform_indices = @transform_2, window_bounds = array<i64: 8, 1>}]} {
    %c0_i32 = arith.constant 0 : i32
    %0 = arith.cmpi eq, %arg1, %c0_i32 : i32
    %1 = arith.extui %0 : i1 to i32
    %c0_i32_0 = arith.constant 0 : i32
    %2 = arith.cmpi ne, %1, %c0_i32_0 : i32
    scf.if %2 {
      %cst_11 = arith.constant 0.000000e+00 : f32
      %15 = vector.broadcast %cst_11 : f32 to vector<8x1xf32>
      %c0_12 = arith.constant 0 : index
      %c0_13 = arith.constant 0 : index
      %16 = vector.load %arg3[%c0_12, %c0_13] : memref<8x1xf32, #tpu.memory_space<vmem>>, vector<8x1xf32>
      tpu.vector_store %arg3[%c0_12, %c0_13], %15 {strides = array<i32>} : memref<8x1xf32, #tpu.memory_space<vmem>>, vector<8x1xf32>,
      %cst_14 = arith.constant 0.000000e+00 : f32
      %17 = vector.broadcast %cst_14 : f32 to vector<8x1xf32>
      %c0_15 = arith.constant 0 : index
      %c0_16 = arith.constant 0 : index
      %18 = vector.load %arg4[%c0_15, %c0_16] : memref<8x1xf32, #tpu.memory_space<vmem>>, vector<8x1xf32>
      tpu.vector_store %arg4[%c0_15, %c0_16], %17 {strides = array<i32>} : memref<8x1xf32, #tpu.memory_space<vmem>>, vector<8x1xf32>,
    } else {
    }
    %c0 = arith.constant 0 : index
    %c0_1 = arith.constant 0 : index
    %3 = vector.load %arg2[%c0, %c0_1] : memref<8x256xf32, #tpu.memory_space<vmem>>, vector<8x256xf32>
    %c0_2 = arith.constant 0 : index
    %c0_3 = arith.constant 0 : index
    %4 = vector.load %arg3[%c0_2, %c0_3] : memref<8x1xf32, #tpu.memory_space<vmem>>, vector<8x1xf32>
    %cst = arith.constant dense<0.000000e+00> : vector<8xf32>
    %5 = vector.multi_reduction <add>, %3, %cst [1] : vector<8x256xf32> to vector<8xf32>
    %6 = vector.shape_cast %5 : vector<8xf32> to vector<8x1xf32>
    %7 = arith.addf %4, %6 : vector<8x1xf32>
    %c0_4 = arith.constant 0 : index
    %c0_5 = arith.constant 0 : index
    %8 = vector.load %arg3[%c0_4, %c0_5] : memref<8x1xf32, #tpu.memory_space<vmem>>, vector<8x1xf32>
    tpu.vector_store %arg3[%c0_4, %c0_5], %7 {strides = array<i32>} : memref<8x1xf32, #tpu.memory_space<vmem>>, vector<8x1xf32>,
    %c0_6 = arith.constant 0 : index
    %c0_7 = arith.constant 0 : index
    %9 = vector.load %arg4[%c0_6, %c0_7] : memref<8x1xf32, #tpu.memory_space<vmem>>, vector<8x1xf32>
    %10 = arith.mulf %3, %3 : vector<8x256xf32>
    %cst_8 = arith.constant dense<0.000000e+00> : vector<8xf32>
    %11 = vector.multi_reduction <add>, %10, %cst_8 [1] : vector<8x256xf32> to vector<8xf32>
    %12 = vector.shape_cast %11 : vector<8xf32> to vector<8x1xf32>
    %13 = arith.addf %9, %12 : vector<8x1xf32>
    %c0_9 = arith.constant 0 : index
    %c0_10 = arith.constant 0 : index
    %14 = vector.load %arg4[%c0_9, %c0_10] : memref<8x1xf32, #tpu.memory_space<vmem>>, vector<8x1xf32>
    tpu.vector_store %arg4[%c0_9, %c0_10], %13 {strides = array<i32>} : memref<8x1xf32, #tpu.memory_space<vmem>>, vector<8x1xf32>,
    return
  }
  func.func @transform_0(%arg0: i32, %arg1: i32) -> (i32, i32) {
    %c0_i32 = arith.constant 0 : i32
    return %arg0, %arg1 : i32, i32
  }
  func.func @transform_1(%arg0: i32, %arg1: i32) -> (i32, i32) {
    %c0_i32 = arith.constant 0 : i32
    %c0_i32_0 = arith.constant 0 : i32
    return %arg0, %c0_i32 : i32, i32
  }
  func.func @transform_2(%arg0: i32, %arg1: i32) -> (i32, i32) {
    %c0_i32 = arith.constant 0 : i32
    %c0_i32_0 = arith.constant 0 : i32
    return %arg0, %c0_i32 : i32, i32
  }
}

</mosaic_0001>

<bundles_post_ra>
// kernel: tpu_custom_call.1
= control target key start
LH: loop header
LB: loop body
LE: loop exit
PB: predicated region body
PF: predicated region fallthrough
CT: control target
= control target key end

     0   :  { %8 = vsyncpa [#allocation3], 0  ;;  %s81_s9 = smov [#allocation2]   ;;  %s132_s0 = inlined_call_operand.hbm [shape: f32[8,256], index: 0, kind: input, shape index: {}]   ;;  %s133_s1 = inlined_call_operand.vmem [shape: f32[8,1], index: 1, kind: output, shape index: {0}]   ;;  %s134_s2 = inlined_call_operand.vmem [shape: f32[8,1], index: 2, kind: output, shape index: {1}]  }
   0x1   :  { %s15_s10 = sshll.u32 %s81_s9, 4  ;;  %s57_s13 = scalar_lea.hbm %s132_s0, 256  ;;  %s16_s10 = int_to_ptr.vmem [resolvable:$true] %s15_s10 }
   0x2   :  { %p58_p0 = scmp.ne.s32.totalorder %s132_s0, %s57_s13  ;;  %p61_p1 = scmp.lt.u32.totalorder %s57_s13, %s132_s0 }
   0x4   :  { %p63_p2 = pnand %p61_p1, %p58_p0 }
   0x6   :  { %66 = shalt.err (!%p63_p2)
}
   0x7   :  { %s67_s18 = scalar_lea.vmem %s16_s10, 256  ;;  %p72_p4 = scmp.lt.s32.totalorder %s16_s10, %s16_s10 }
   0x8   :  { %p68_p3 = scmp.ne.s32.totalorder %s16_s10, %s67_s18  ;;  %p73_p5 = scmp.lt.s32.totalorder %s67_s18, %s67_s18 }
   0xa   :  { %p74_p6 = por %p73_p5, %p72_p4 }
   0xc   :  { %p75_p7 = pnand %p74_p6, %p68_p3 }
   0xe   :  { %78 = shalt.err (!%p75_p7)
}
   0xf   :  { %18 = dma.hbm_to_vmem [thread:$0]  %s132_s0, 256, %s16_s10, [#allocation3]  }
  0x10   :  { %79 = dma.done.wait [#allocation3], 256  }
  0x11   :  { %80 = vsyncadd [#allocation3], 4294967040  ;;  %vm26_vm0 = vcmask 7168   ;;  %v82_v0 = vmov 0.0   ;;  %v29_v1 = vld [vmem:[#allocation2] sm:$0xff]  ;;  %v30_v2 = vld [vmem:[#allocation2 + $0x8] sm:$0xff] }
  0x12   :  { %27 = vst.msk [vmem:[%s133_s1] sm:$0xff] %vm26_vm0, %v82_v0  ;;  %28 = vst.msk [vmem:[%s134_s2] sm:$0xff] %vm26_vm0, %v82_v0  ;;  %v32_v3 = vadd.f32 %v30_v2, %v29_v1  ;;  %v39_v4 = vmul.f32 %v29_v1, %v29_v1  ;;  %v40_v5 = vmul.f32 %v30_v2, %v30_v2 }
  0x14   :  { %33 = vadd.xlane.f32.xlu0 %v32_v3  ;;  %v41_v6 = vadd.f32 %v40_v5, %v39_v4 }
  0x18   :  { %42 = vadd.xlane.f32.xlu0 %v41_v6 }
  0x19   :  { %v31_v7 = vld [vmem:[%s133_s1] sm:$0xff] }
  0x1a   :  { %v38_v10 = vld [vmem:[%s134_s2] sm:$0xff] }
  0xa1   :  { %v34_v8 = vpop.xlane.xlu0 %33 }
  0xa2   :  { %v35_v9 = vadd.f32 %v34_v8, %v31_v7 }
  0xa4   :  { %37 = vst.msk [vmem:[%s133_s1] sm:$0xff] %vm26_vm0, %v35_v9 }
  0xa5   :  { %v43_v11 = vpop.xlane.xlu0 %42 }
  0xa6   :  { %v44_v12 = vadd.f32 %v43_v11, %v38_v10 }
  0xa8   :  { %45 = vst.msk [vmem:[%s134_s2] sm:$0xff] %vm26_vm0, %v44_v12 }
  0xa9   :  { %54 = vsyncpa [#allocation3], 1 }

</bundles_post_ra>
